<compile_context>
chip_gen: v7x
topology: tpu7x:2x2x1
jax: 0.10.0
libtpu: 0.0.40
codegen_flags: <defaults>
</compile_context>

<pallas_src>
import jax
import jax.numpy as jnp
from jax.experimental import pallas as pl
from jax.experimental.pallas import tpu as pltpu


def _cell_kernel(scale_ref, pp_ref, pa_ref, pb_ref, w_ref, b_ref, out_ref):
    # scale_ref : (3,)  f32 in SMEM   -- 3*softmax(betas), hoisted to the wrapper
    # pp/pa/pb  : (1, C, THW) bf16    -- preprocessed inputs (direct_connect = id)
    # w_ref     : (C, C) bf16         -- fused channel_keep weight W_eff
    # b_ref     : (C, 1) f32          -- channel_keep bias
    # out_ref   : (1, C, THW) f32
    s0 = scale_ref[0]
    s1 = scale_ref[1]
    s2 = scale_ref[2]

    # bf16-streamed activations; upcast to f32 for the weighted sum + ReLU
    # (v5e VPU has no bf16 arithmetic; on v6e/v7x the cast is cheap and hidden).
    pp = pp_ref[0].astype(jnp.float32)
    pa = pa_ref[0].astype(jnp.float32)
    pb = pb_ref[0].astype(jnp.float32)

    # Connection_Combination: ReLU(3*b0*pp + 3*b1*pa + 3*b2*pb)
    node1 = jnp.maximum(s0 * pp + s1 * pa + s2 * pb, 0.0)          # (C, THW) f32

    # Fused Ops_Combination + channel_keep:
    #   h0 = g0*node1, h1 = (g1 + g2*g0)*node1
    #   out = W[:, :C]@h0 + W[:, C:]@h1 + b = W_eff @ node1 + b
    out = jnp.dot(w_ref[...], node1.astype(jnp.bfloat16),
                  preferred_element_type=jnp.float32) + b_ref[...]
    out_ref[0] = out.astype(out_ref.dtype)


def cell_forward(prev_paral, prev_above, prev_below, prev_prev, alphas, betas,
                 w_keep, b_keep, *, tile_hw=None):
    del prev_prev  # skip=False, input_nodes_num=1 -> prev_prev unused by forward()
    N, C, H, W = prev_paral.shape
    HW = H * W
    if tile_hw is None:
        tile_hw = HW                      # whole spatial slab per step (small problem)
    assert HW % tile_hw == 0 and (tile_hw % 128 == 0 or tile_hw == HW), \
        "lane tile must be a multiple of 128 (or the full H*W extent)"

    # ---- hoisted scalar math: softmaxes + mixed-op gates (identity/zero ops) ----
    f32 = jnp.float32
    bsm = jax.nn.softmax(betas.astype(f32), axis=-1)               # (3,)
    scales = (3.0 * bsm).astype(f32)                               # 3*softmax(betas)
    asm = jax.nn.softmax(alphas.astype(f32), axis=-1)              # (3, 2)
    num_ops = 2.0
    g0 = num_ops * asm[0, 0]
    g1 = num_ops * asm[1, 0]
    g2 = num_ops * asm[2, 0]
    # Fused channel_keep weight: out = (g0*W_top + (g1+g2*g0)*W_bot) @ node1 + b
    w2d = w_keep.reshape(C, 2 * C).astype(f32)                     # (C_out, 2*C_in)
    w_eff = (g0 * w2d[:, :C] + (g1 + g2 * g0) * w2d[:, C:]).astype(jnp.bfloat16)
    bias = b_keep.reshape(C, 1).astype(f32)

    # ---- NCHW kept: channels -> sublanes, H*W -> lanes (free reshapes only) ----
    pp = prev_paral.reshape(N, C, HW)
    pa = prev_above.reshape(N, C, HW)
    pb = prev_below.reshape(N, C, HW)

    io_block = (1, C, tile_hw)
    io_map = lambda n, s: (n, 0, s)
    grid = (N, HW // tile_hw)             # >= 2 parallel steps -> feeds both v7x TCs

    out = pl.pallas_call(
        _cell_kernel,
        out_shape=jax.ShapeDtypeStruct((N, C, HW), jnp.float32),
        grid=grid,
        in_specs=[
            pl.BlockSpec(memory_space=pltpu.MemorySpace.SMEM),     # scales (3,) f32
            pl.BlockSpec(io_block, io_map),                        # prev_parallel
            pl.BlockSpec(io_block, io_map),                        # prev_above
            pl.BlockSpec(io_block, io_map),                        # prev_below
            pl.BlockSpec((C, C), lambda n, s: (0, 0)),             # fused W_eff
            pl.BlockSpec((C, 1), lambda n, s: (0, 0)),             # bias
        ],
        out_specs=pl.BlockSpec(io_block, io_map),
        compiler_params=pltpu.CompilerParams(
            dimension_semantics=("parallel", "parallel")),
    )(scales, pp, pa, pb, w_eff, bias)

    return out.reshape(N, C, H, W)


def cell_reference(prev_paral, prev_above, prev_below, prev_prev, alphas, betas,
                   w_keep, b_keep):
    """Pure-JAX mirror of Cell.forward with the same OPS/Connections choices."""
    del prev_prev
    f32 = jnp.float32
    pp = prev_paral.astype(f32)
    pa = prev_above.astype(f32)
    pb = prev_below.astype(f32)
    bsm = jax.nn.softmax(betas.astype(f32), axis=-1)
    node1 = jax.nn.relu(3.0 * bsm[0] * pp + 3.0 * bsm[1] * pa + 3.0 * bsm[2] * pb)
    asm = jax.nn.softmax(alphas.astype(f32), axis=-1)

    def mixed_op(x, a):                      # ops = ['identity', 'zero']
        return 2.0 * (a[0] * x + a[1] * jnp.zeros_like(x))

    h0 = mixed_op(node1, asm[0])
    h1 = mixed_op(node1, asm[1]) + mixed_op(h0, asm[2])
    cat = jnp.concatenate([h0, h1], axis=1)  # NCHW channel concat
    C = w_keep.shape[0]
    out = jnp.einsum('nihw,oi->nohw', cat, w_keep.reshape(C, 2 * C).astype(f32))
    return out + b_keep.astype(f32)[None, :, None, None]


if __name__ == "__main__":
    key = jax.random.PRNGKey(0)
    N, C, H, W = 2, 32, 16, 16
    ks = jax.random.split(key, 8)
    # Activations arrive in bf16 (streaming dtype); parameters stay f32.
    mk = lambda k: jax.random.normal(k, (N, C, H, W), jnp.float32).astype(jnp.bfloat16)
    prev_paral, prev_above = mk(ks[0]), mk(ks[1])
    prev_below, prev_prev = mk(ks[2]), mk(ks[3])
    alphas = 0.1 * jax.random.normal(ks[4], (3, 2), jnp.float32)   # 3 edges x 2 ops
    betas = 0.1 * jax.random.normal(ks[5], (3,), jnp.float32)      # 3 connection types
    w_keep = 0.05 * jax.random.normal(ks[6], (C, 2 * C, 1, 1), jnp.float32)  # Conv2d(2c,c,1)
    b_keep = 0.05 * jax.random.normal(ks[7], (C,), jnp.float32)

    out = cell_forward(prev_paral, prev_above, prev_below, prev_prev,
                       alphas, betas, w_keep, b_keep)
    out = jax.block_until_ready(out)

    ref = cell_reference(prev_paral, prev_above, prev_below, prev_prev,
                         alphas, betas, w_keep, b_keep)
    assert out.shape == (N, C, H, W)
    err = float(jnp.max(jnp.abs(out - ref)))
    # bf16 streaming + bf16 MXU operands -> loosened tolerance (f32 accumulation).
    assert jnp.allclose(out, ref, atol=2e-2, rtol=2e-2), f"max abs err {err}"
    print("KERNEL_OK")
</pallas_src>

<mosaic_0001>
module attributes {stable_mosaic.version = 11 : i64} {
  func.func @_cell_kernel(%arg0: i32, %arg1: i32, %arg2: memref<3xf32, #tpu.memory_space<smem>>, %arg3: memref<1x32x256xbf16, #tpu.memory_space<vmem>>, %arg4: memref<1x32x256xbf16, #tpu.memory_space<vmem>>, %arg5: memref<1x32x256xbf16, #tpu.memory_space<vmem>>, %arg6: memref<32x32xbf16, #tpu.memory_space<vmem>>, %arg7: memref<32x1xf32, #tpu.memory_space<vmem>>, %arg8: memref<1x32x256xf32, #tpu.memory_space<vmem>>) attributes {dimension_semantics = [#tpu.dimension_semantics<parallel>, #tpu.dimension_semantics<parallel>], iteration_bounds = array<i64: 2, 1>, scalar_prefetch = 0 : i64, scratch_operands = 0 : i64, tpu.core_type = #tpu.core_type<tc>, window_params = [{transform_indices = @transform_0, window_bounds = array<i64: 3>}, {transform_indices = @transform_1, window_bounds = array<i64: 1, 32, 256>}, {transform_indices = @transform_2, window_bounds = array<i64: 1, 32, 256>}, {transform_indices = @transform_3, window_bounds = array<i64: 1, 32, 256>}, {pipeline_mode = #tpu.pipeline_mode<synchronous>, transform_indices = @transform_4, window_bounds = array<i64: 32, 32>}, {pipeline_mode = #tpu.pipeline_mode<synchronous>, transform_indices = @transform_5, window_bounds = array<i64: 32, 1>}, {transform_indices = @transform_6, window_bounds = array<i64: 1, 32, 256>}]} {
    %c0 = arith.constant 0 : index
    %0 = memref.load %arg2[%c0] : memref<3xf32, #tpu.memory_space<smem>>
    %c1 = arith.constant 1 : index
    %1 = memref.load %arg2[%c1] : memref<3xf32, #tpu.memory_space<smem>>
    %c2 = arith.constant 2 : index
    %2 = memref.load %arg2[%c2] : memref<3xf32, #tpu.memory_space<smem>>
    %c0_0 = arith.constant 0 : index
    %c0_1 = arith.constant 0 : index
    %c0_2 = arith.constant 0 : index
    %3 = vector.load %arg3[%c0_0, %c0_1, %c0_2] : memref<1x32x256xbf16, #tpu.memory_space<vmem>>, vector<1x32x256xbf16>
    %4 = vector.shape_cast %3 : vector<1x32x256xbf16> to vector<32x256xbf16>
    %5 = arith.extf %4 : vector<32x256xbf16> to vector<32x256xf32>
    %c0_3 = arith.constant 0 : index
    %c0_4 = arith.constant 0 : index
    %c0_5 = arith.constant 0 : index
    %6 = vector.load %arg4[%c0_3, %c0_4, %c0_5] : memref<1x32x256xbf16, #tpu.memory_space<vmem>>, vector<1x32x256xbf16>
    %7 = vector.shape_cast %6 : vector<1x32x256xbf16> to vector<32x256xbf16>
    %8 = arith.extf %7 : vector<32x256xbf16> to vector<32x256xf32>
    %c0_6 = arith.constant 0 : index
    %c0_7 = arith.constant 0 : index
    %c0_8 = arith.constant 0 : index
    %9 = vector.load %arg5[%c0_6, %c0_7, %c0_8] : memref<1x32x256xbf16, #tpu.memory_space<vmem>>, vector<1x32x256xbf16>
    %10 = vector.shape_cast %9 : vector<1x32x256xbf16> to vector<32x256xbf16>
    %11 = arith.extf %10 : vector<32x256xbf16> to vector<32x256xf32>
    %12 = vector.broadcast %0 : f32 to vector<32x256xf32>
    %13 = arith.mulf %12, %5 : vector<32x256xf32>
    %14 = vector.broadcast %1 : f32 to vector<32x256xf32>
    %15 = arith.mulf %14, %8 : vector<32x256xf32>
    %16 = arith.addf %13, %15 : vector<32x256xf32>
    %17 = vector.broadcast %2 : f32 to vector<32x256xf32>
    %18 = arith.mulf %17, %11 : vector<32x256xf32>
    %19 = arith.addf %16, %18 : vector<32x256xf32>
    %cst = arith.constant 0.000000e+00 : f32
    %20 = vector.broadcast %cst : f32 to vector<32x256xf32>
    %21 = arith.maximumf %19, %20 : vector<32x256xf32>
    %c0_9 = arith.constant 0 : index
    %c0_10 = arith.constant 0 : index
    %22 = vector.load %arg6[%c0_9, %c0_10] : memref<32x32xbf16, #tpu.memory_space<vmem>>, vector<32x32xbf16>
    %23 = arith.truncf %21 : vector<32x256xf32> to vector<32x256xbf16>
    %cst_11 = arith.constant dense<0.000000e+00> : vector<32x256xf32>
    %24 = tpu.matmul %22, %23, %cst_11 {dimension_numbers = #tpu.dot_dimension_numbers<[1], [0], [0], [1], [0, 0, 1, 1], [], []>} : vector<32x32xbf16>, vector<32x256xbf16>, vector<32x256xf32> -> vector<32x256xf32>
    %c0_12 = arith.constant 0 : index
    %c0_13 = arith.constant 0 : index
    %25 = vector.load %arg7[%c0_12, %c0_13] : memref<32x1xf32, #tpu.memory_space<vmem>>, vector<32x1xf32>
    %26 = vector.broadcast %25 : vector<32x1xf32> to vector<32x256xf32>
    %27 = arith.addf %24, %26 : vector<32x256xf32>
    %c0_14 = arith.constant 0 : index
    %c0_15 = arith.constant 0 : index
    %c0_16 = arith.constant 0 : index
    %28 = vector.load %arg8[%c0_14, %c0_15, %c0_16] : memref<1x32x256xf32, #tpu.memory_space<vmem>>, vector<1x32x256xf32>
    %29 = vector.shape_cast %28 : vector<1x32x256xf32> to vector<32x256xf32>
    %30 = vector.shape_cast %27 : vector<32x256xf32> to vector<1x32x256xf32>
    tpu.vector_store %arg8[%c0_14, %c0_15, %c0_16], %30 {strides = array<i32>} : memref<1x32x256xf32, #tpu.memory_space<vmem>>, vector<1x32x256xf32>,
    return
  }
  func.func @transform_0(%arg0: i32, %arg1: i32) -> i32 {
    %c0_i32 = arith.constant 0 : i32
    %c0_i32_0 = arith.constant 0 : i32
    return %c0_i32 : i32
  }
  func.func @transform_1(%arg0: i32, %arg1: i32) -> (i32, i32, i32) {
    %c0_i32 = arith.constant 0 : i32
    %c0_i32_0 = arith.constant 0 : i32
    return %arg0, %c0_i32, %arg1 : i32, i32, i32
  }
  func.func @transform_2(%arg0: i32, %arg1: i32) -> (i32, i32, i32) {
    %c0_i32 = arith.constant 0 : i32
    %c0_i32_0 = arith.constant 0 : i32
    return %arg0, %c0_i32, %arg1 : i32, i32, i32
  }
  func.func @transform_3(%arg0: i32, %arg1: i32) -> (i32, i32, i32) {
    %c0_i32 = arith.constant 0 : i32
    %c0_i32_0 = arith.constant 0 : i32
    return %arg0, %c0_i32, %arg1 : i32, i32, i32
  }
  func.func @transform_4(%arg0: i32, %arg1: i32) -> (i32, i32) {
    %c0_i32 = arith.constant 0 : i32
    %c0_i32_0 = arith.constant 0 : i32
    %c0_i32_1 = arith.constant 0 : i32
    return %c0_i32, %c0_i32_0 : i32, i32
  }
  func.func @transform_5(%arg0: i32, %arg1: i32) -> (i32, i32) {
    %c0_i32 = arith.constant 0 : i32
    %c0_i32_0 = arith.constant 0 : i32
    %c0_i32_1 = arith.constant 0 : i32
    return %c0_i32, %c0_i32_0 : i32, i32
  }
  func.func @transform_6(%arg0: i32, %arg1: i32) -> (i32, i32, i32) {
    %c0_i32 = arith.constant 0 : i32
    %c0_i32_0 = arith.constant 0 : i32
    return %arg0, %c0_i32, %arg1 : i32, i32, i32
  }
}

</mosaic_0001>

<bundles_post_ra>
// kernel: tpu_custom_call.1
= control target key start
LH: loop header
LB: loop body
LE: loop exit
PB: predicated region body
PF: predicated region fallthrough
CT: control target
= control target key end

     0   :  { %s1465_s0 = inlined_call_operand.vmem [shape: f32[3], index: 0, kind: input, shape index: {}]   ;;  %s1466_s1 = inlined_call_operand.hbm [shape: bf16[2,32,256], index: 1, kind: input, shape index: {}]   ;;  %s1467_s2 = inlined_call_operand.hbm [shape: bf16[2,32,256], index: 2, kind: input, shape index: {}]   ;;  %s1468_s3 = inlined_call_operand.hbm [shape: bf16[2,32,256], index: 3, kind: input, shape index: {}]   ;;  %s1469_s4 = inlined_call_operand.vmem [shape: bf16[32,32], index: 4, kind: input, shape index: {}]   ;;  %s1470_s5 = inlined_call_operand.vmem [shape: f32[32,1], index: 5, kind: input, shape index: {}]   ;;  %s1471_s6 = inlined_call_operand.hbm [shape: f32[2,32,256], index: 6, kind: output, shape index: {}]  }
   0x1   :  { %1487 = sst [smem:[#allocation19_spill]] %s1465_s0 }
   0x2   :  { %1488 = sst [smem:[#allocation20_spill]] %s1467_s2 }
   0x3   :  { %11 = vsyncpa [#allocation5], 0 }
   0x4   :  { %12 = vsyncpa [#allocation3], 0 }
   0x5   :  { %14 = vsyncpa [#allocation3 + $0x1], 0 }
   0x6   :  { %15 = vsyncpa [#allocation8], 0 }
   0x7   :  { %17 = vsyncpa [#allocation8 + $0x1], 0 }
   0x8   :  { %18 = vsyncpa [#allocation4], 0 }
   0x9   :  { %20 = vsyncpa [#allocation4 + $0x1], 0  ;;  %s1129_s21 = smov 0   ;;  %s1131_s22 = smov 0  }
   0xa   :  { %s1133_s23 = smov 0   ;;  %s1135_s24 = smov 0  }
   0xb   :  { %s1137_s25 = smov 0   ;;  %s1139_s26 = smov 0  }
   0xc LB: > { %1489 = sst [smem:[#allocation15_spill]] %s1078_s25  ;;  %s38_s27 = sadd.s32 1, %s1078_s25  ;;  %s1082_s26 = sphi %s1139_s26, %s26_s26   ;;  %s1078_s25 = sphi %s1137_s25, %s1517_s25   ;;  %s1074_s24 = sphi %s1135_s24, %s1516_s24   ;;  %s1070_s23 = sphi %s1133_s23, %s1520_s23   ;;  %s1066_s22 = sphi %s1131_s22, %s1519_s22   ;;  %s1062_s21 = sphi %s1129_s21, %s1518_s21  }
   0xd   : > { %1490 = sst [smem:[#allocation16_spill]] %s1082_s26  ;;  %s68_s28 = sadd.s32 1, %s1070_s23 }
   0xe   : > { %p40_p0 = scmp.ge.s32.totalorder %s38_s27, 2  ;;  %p1472_p1 = scmp.ne.s32.totalorder %s1070_s23, %s1066_s22 }
   0xf   : > { %p76_p2 = scmp.eq.s32.totalorder %s1082_s26, 0  ;;  %p826_p5 = scmp.lt.s32.totalorder %s1082_s26, 2 }
  0x10   : > { %s1522_s27 = smov (%p40_p0, %s38_s27), 0  ;;  %s1477_s30 = sand.u32 1, %s1070_s23  }
  0x11   : > { %1491 = sst [smem:[#allocation17_spill]] %s1522_s27  ;;  %p77_p4 = por %p76_p2, %p1472_p1 }
  0x12   : > { %s63_s29 = ssub.s32 %s1078_s25, %s1522_s27  ;;  %s1176_s7 = sshll.u32 %s1477_s30, 5 }
  0x13   : > { %p66_p6 = scmp.eq.s32.totalorder %s63_s29, 0  ;;  %s1179_s8 = sshll.u32 %s1078_s25, 9 }
  0x14   : > { %p1181_p7 = pnand %p826_p5, %p77_p4  ;;  %s271_s11 = sand.u32 1, %s1082_s26  }
  0x15   : > { %s1186_s10 = scalar_select %p66_p6, %s1070_s23, %s68_s28  }
  0x16   : > { %s1494_s2 = sld [smem:[#allocation20_spill]]  ;;  %s275_s15 = scalar_lea.vmem [#allocation7], %s1176_s7 }
  0x17   : > { %1493 = sst [smem:[#allocation18_spill]] %s1186_s10  ;;  %s284_s16 = sshll.u32 %s275_s15, 4  ;;  %s1196_s16 = int_to_ptr.vmem [resolvable:$true] %s284_s16 }
  0x18   : > { %s1198_s17 = scalar_lea.sflag [#allocation8], %s271_s11  ;;  %p1204_p9 = pneg %p1181_p7 }
  0x1c   : > { %s1193_s14 = scalar_lea.hbm %s1494_s2, %s1179_s8  ;;  %s892_s29 = scalar_lea.hbm %s1494_s2, 1024 }
  0x1d   : > { %s887_s18 = scalar_lea.hbm %s1193_s14, 512  ;;  %p893_p12 = scmp.lt.u32.totalorder %s1193_s14, %s1494_s2 }
  0x1e   : > { %p888_p8 = scmp.ne.s32.totalorder %s1193_s14, %s887_s18  ;;  %p894_p13 = scmp.lt.u32.totalorder %s892_s29, %s887_s18 }
  0x1f   : > { %p896_p2 = scmp.lt.u32.totalorder %s887_s18, %s1193_s14 }
  0x20   : > { %p890_p10 = pnand %p1204_p9, %p888_p8  ;;  %p895_p0 = por %p894_p13, %p893_p12 }
  0x22   : > { %p891_p11 = pneg %p890_p10  ;;  %p897_p4 = por %p896_p2, %p895_p0 }
  0x24   : > { %p898_p5 = pnand %p897_p4, %p891_p11 }
  0x26   : > { %901 = shalt.err (!%p898_p5)
}
  0x27   : > { %s902_s11 = scalar_lea.vmem %s1196_s16, 512  ;;  %s1084_s15 = smov [#allocation7]  }
  0x28   : > { %p903_p6 = scmp.ne.s32.totalorder %s1196_s16, %s902_s11  ;;  %s907_s20 = sshll.u32 %s1084_s15, 4  ;;  %s908_s20 = int_to_ptr.vmem [resolvable:$false] %s907_s20 }
  0x29   : > { %s909_s28 = scalar_lea.vmem %s908_s20, 1024  ;;  %p910_p3 = scmp.lt.s32.totalorder %s1196_s16, %s908_s20 }
  0x2a   : > { %p905_p8 = pnand %p903_p6, %p1204_p9  ;;  %p911_p1 = scmp.lt.s32.totalorder %s909_s28, %s902_s11 }
  0x2c   : > { %p906_p10 = pneg %p905_p8  ;;  %p912_p12 = por %p911_p1, %p910_p3 }
  0x2e   : > { %p913_p13 = pnand %p912_p12, %p906_p10 }
  0x30   : > { %916 = shalt.err (!%p913_p13)
}
  0x31   : > { %s1473_s18 = smov 128   ;;  %s1475_s29 = smov 8  }
  0x32   : > { %817 = dma.hbm_to_vmem [thread:$0]  (!%p1181_p7), %s1193_s14, 512, %s1196_s16, %s1198_s17, %s1473_s18, %s1473_s18, %s1475_s29  }
  0x33   : > { %s1232_s12 = sadd.s32 4294967295, %s1082_s26   ;;  %s757_s13 = sadd.s32 4294967294, %s1082_s26  }
  0x34   : > { %p81_p1 = scmp.ne.s32.totalorder %s1066_s22, %s1062_s21  ;;  %p1482_p3 = scmp.eq.s32.totalorder %s1232_s12, 0 }
  0x35   : > { %p205_p11 = scmp.eq.s32.totalorder %s1232_s12, 1  ;;  %p211_p0 = scmp.eq.s32.totalorder %s757_s13, 1 }
  0x36   : > { %p758_p2 = scmp.ge.s32.totalorder %s1082_s26, 1  ;;  %p1242_p4 = por %p1482_p3, %p81_p1 }
  0x37   : > { %p1497_p5 = scmp.ne.s32.totalorder %s1070_s23, %s1066_s22  ;;  %p1253_p8 = por %p211_p0, %p81_p1 }
  0x38   : > { %s1496_s11 = scalar_select %p1242_p4, 1, 0 }
  0x39   : > { %p1249_p6 = por %p205_p11, %p1497_p5  ;;  %p218_p10 = scmp.lt.s32.totalorder %s1082_s26, 3 }
  0x3a   : > { %s1499_s16 = scalar_select %p1253_p8, 1, 0 }
  0x3b   : > { %s1498_s14 = scalar_select %p1249_p6, 1, 0 }
  0x3c   : > { %s1500_s0 = sld [smem:[#allocation19_spill]]  ;;  %p1261_p12 = pnand %p758_p2, %p218_p10 }
  0x3d   : > { %s1273_s30 = scalar_lea.hbm %s1466_s1, %s1179_s8  ;;  %s252_s15 = scalar_lea.vmem [#allocation6], %s1176_s7 }
  0x3e   : > { %s1501_s13 = scalar_select %p1261_p12, 1, 0 }
  0x3f   : > { %p807_p13 = pneg %p1261_p12  ;;  %s261_s20 = sshll.u32 %s252_s15, 4  ;;  %s1282_s20 = int_to_ptr.vmem [resolvable:$true] %s261_s20 }
  0x40   : > { %s1503_s2 = sand.u32 1, %s1070_s23   ;;  %s917_s25 = scalar_lea.hbm %s1273_s30, 512 }
  0x41   : > { %p1278_p1 = pnand %p807_p13, %p1482_p3  ;;  %s1286_s27 = scalar_lea.sflag [#allocation3], %s1503_s2 }
  0x42   : > { %s231_s28 = sshll.u32 %s1500_s0, 4  ;;  %p918_p11 = scmp.ne.s32.totalorder %s1273_s30, %s917_s25  ;;  %s1265_s28 = int_to_ptr.vmem [resolvable:$true] %s231_s28 }
  0x43   : > { %s1502_s0 = scalar_select %p1278_p1, 1, 0 }
  0x44   : > { %p920_p0 = pnand %p918_p11, %p1204_p9  ;;  %s922_s10 = scalar_lea.hbm %s1466_s1, 1024 }
  0x45   : > { %p923_p5 = scmp.lt.u32.totalorder %s1273_s30, %s1466_s1  ;;  %p924_p10 = scmp.lt.u32.totalorder %s922_s10, %s917_s25 }
  0x46   : > { %p921_p2 = pneg %p920_p0  ;;  %p926_p3 = scmp.lt.u32.totalorder %s917_s25, %s1273_s30 }
  0x47   : > { %p925_p13 = por %p924_p10, %p923_p5 }
  0x49   : > { %p927_p8 = por %p926_p3, %p925_p13 }
  0x4b   : > { %p928_p6 = pnand %p927_p8, %p921_p2 }
  0x4d   : > { %931 = shalt.err (!%p928_p6)
}
  0x4e   : > { %s932_s2 = scalar_lea.vmem %s1282_s20, 512  ;;  %s1087_s18 = smov [#allocation6]  }
  0x4f   : > { %p933_p11 = scmp.ne.s32.totalorder %s1282_s20, %s932_s2  ;;  %s937_s29 = sshll.u32 %s1087_s18, 4  ;;  %s938_s29 = int_to_ptr.vmem [resolvable:$false] %s937_s29 }
  0x50   : > { %s939_s26 = scalar_lea.vmem %s938_s29, 1024  ;;  %p940_p12 = scmp.lt.s32.totalorder %s1282_s20, %s938_s29 }
  0x51   : > { %p935_p0 = pnand %p933_p11, %p1204_p9  ;;  %p941_p1 = scmp.lt.s32.totalorder %s939_s26, %s932_s2 }
  0x53   : > { %p936_p4 = pneg %p935_p0  ;;  %p942_p5 = por %p941_p1, %p940_p12 }
  0x55   : > { %p943_p10 = pnand %p942_p5, %p936_p4 }
  0x57   : > { %946 = shalt.err (!%p943_p10)
}
  0x58   : > { %s1504_s25 = smov 8   ;;  %s1505_s10 = smov 128  }
  0x59   : > { %814 = dma.hbm_to_vmem [thread:$0]  (!%p1181_p7), %s1273_s30, 512, %s1282_s20, %s1286_s27, %s1505_s10, %s1505_s10, %s1504_s25  }
  0x5a   : > { %s947_s15 = scalar_lea.vmem %s1265_s28, 16  ;;  %p1506_p6 = scmp.ne.s32.totalorder %s1502_s0, 0 }
  0x5b   : > { %p948_p3 = scmp.ne.s32.totalorder %s1265_s28, %s947_s15  ;;  %p955_p1 = scmp.lt.s32.totalorder %s1265_s28, %s1265_s28 }
  0x5c   : > { %p949_p8 = pneg %p1506_p6  ;;  %p956_p2 = scmp.lt.s32.totalorder %s947_s15, %s947_s15 }
  0x5e   : > { %p950_p12 = pnand %p949_p8, %p948_p3  ;;  %p957_p13 = por %p956_p2, %p955_p1 }
  0x60   : > { %p951_p4 = pneg %p950_p12 }
  0x62   : > { %p958_p11 = pnand %p957_p13, %p951_p4 }
  0x64   : > { %961 = shalt.err (!%p958_p11)
}
  0x65   : > { %s1088_s2 = smov [#allocation2]   ;;  %s1326_s20 = scalar_lea.hbm %s1468_s3, %s1179_s8 }
  0x66   : > { %810 = dma.vmem_to_smem (!%p1506_p6), %s1265_s28, 16, %s1088_s2, [#allocation5]  }
  0x67   : > { %s298_s18 = scalar_lea.vmem [#allocation9], %s1176_s7  ;;  %s962_s26 = scalar_lea.hbm %s1326_s20, 512 }
  0x68   : > { %s307_s29 = sshll.u32 %s298_s18, 4  ;;  %p963_p0 = scmp.ne.s32.totalorder %s1326_s20, %s962_s26  ;;  %s1329_s29 = int_to_ptr.vmem [resolvable:$true] %s307_s29 }
  0x69   : > { %s967_s15 = scalar_lea.hbm %s1468_s3, 1024  ;;  %p968_p3 = scmp.lt.u32.totalorder %s1326_s20, %s1468_s3 }
  0x6a   : > { %p965_p5 = pnand %p963_p0, %p1204_p9  ;;  %p969_p6 = scmp.lt.u32.totalorder %s967_s15, %s962_s26 }
  0x6b   : > { %p971_p12 = scmp.lt.u32.totalorder %s962_s26, %s1326_s20 }
  0x6c   : > { %p966_p10 = pneg %p965_p5  ;;  %p970_p8 = por %p969_p6, %p968_p3 }
  0x6e   : > { %p972_p4 = por %p971_p12, %p970_p8 }
  0x70   : > { %p973_p1 = pnand %p972_p4, %p966_p10 }
  0x72   : > { %976 = shalt.err (!%p973_p1)
}
  0x73   : > { %s977_s7 = scalar_lea.vmem %s1329_s29, 512  ;;  %s1089_s27 = smov [#allocation9]  }
  0x74   : > { %p978_p2 = scmp.ne.s32.totalorder %s1329_s29, %s977_s7  ;;  %s982_s30 = sshll.u32 %s1089_s27, 4  ;;  %s983_s30 = int_to_ptr.vmem [resolvable:$false] %s982_s30 }
  0x75   : > { %s984_s18 = scalar_lea.vmem %s983_s30, 1024  ;;  %p985_p0 = scmp.lt.s32.totalorder %s1329_s29, %s983_s30 }
  0x76   : > { %p980_p13 = pnand %p978_p2, %p1204_p9  ;;  %p986_p5 = scmp.lt.s32.totalorder %s984_s18, %s977_s7 }
  0x78   : > { %p981_p11 = pneg %p980_p13  ;;  %p987_p3 = por %p986_p5, %p985_p0 }
  0x7a   : > { %p988_p6 = pnand %p987_p3, %p981_p11 }
  0x7c   : > { %991 = shalt.err (!%p988_p6)
}
  0x7d   : > { %820 = dma.hbm_to_vmem [thread:$0]  (!%p1181_p7), %s1326_s20, 512, %s1329_s29, %s1198_s17, %s1505_s10, %s1505_s10, %s1504_s25  }
  0x7e   : > { %p1507_p9 = scmp.ne.s32.totalorder %s1501_s13, 0 }
  0x7f   : > { %p1508_p10 = scmp.eq.s32.totalorder (!%p1507_p9), %s1232_s12, 0 }
  0x80   : > { %319 = sbr.rel (%p1507_p9) target bundleno = 407 (0x197), region = 44 }
  0x87   : > { %1045 = dma.done.wait (%p1508_p10), [#allocation5], 16   ;;  %p1509_p8 = pmov %p1508_p10 }
  0x88   : > { %s1363_s19 = sand.u32 1, %s1066_s22   ;;  %p1510_p12 = scmp.ne.s32.totalorder %s1496_s11, 0 }
  0x89   : > { %1047 = vsyncadd (%p1509_p8), [#allocation5], 4294967280  ;;  %s772_s9 = sshll.u32 %s1363_s19, 5  ;;  %s326_s26 = scalar_lea.sflag [#allocation3], %s1363_s19 }
  0x8a   : > { %s329_s0 = scalar_lea.vmem [#allocation6], %s772_s9 }
  0x8b   : > { %1049 = dma.done.wait (%p1510_p12), %s326_s26, 512  }
  0x8c   : > { %1051 = vsyncadd (%p1510_p12), %s326_s26, 4294966784  ;;  %s334_s17 = sand.u32 1, %s1232_s12   ;;  %s338_s25 = scalar_lea.vmem [#allocation7], %s772_s9 }
  0x8d   : > { %s335_s13 = scalar_lea.sflag [#allocation8], %s334_s17 }
  0x8e   : > { %1053 = dma.done.wait (%p1510_p12), %s335_s13, 1024  }
  0x8f   : > { %1055 = vsyncadd (%p1510_p12), %s335_s13, 4294966272  ;;  %s1376_s10 = scalar_lea.vmem [#allocation9], %s772_s9 }
  0x90   : > { %352 = sfence }
  0x91   : > { %s1378_s20 = sld [smem:[#allocation2]]  ;;  %s1380_s29 = sld [smem:[#allocation2 + $0x1]]  ;;  %v395_v0 = vld [vmem:[%s329_s0] sm:$0xff]  ;;  %v396_v1 = vld [vmem:[%s329_s0 + $0x8] sm:$0xff]  ;;  %v397_v14 = vld [vmem:[%s329_s0 + $0x10] sm:$0xff]  ;;  %vm524_vm0 = vcmask 261120  }
  0x92   : > { %s1382_s28 = sld [smem:[#allocation2 + $0x2]]  ;;  %v400_v2 = vunpack.c.h.bf16 %v395_v0  ;;  %v402_v3 = vunpack.c.h.bf16 %v396_v1  ;;  %v407_v4 = vld [vmem:[%s338_s25] sm:$0xff]  ;;  %v408_v5 = vld [vmem:[%s338_s25 + $0x8] sm:$0xff]  ;;  %v399_v7 = vunpack.c.l.bf16 %v395_v0  ;;  %v401_v8 = vunpack.c.l.bf16 %v396_v1  ;;  %v398_v15 = vld [vmem:[%s329_s0 + $0x18] sm:$0xff]  ;;  %s775_s17 = sshll.u32 %s1363_s19, 6 }
  0x93   : > { %v419_v6 = vld [vmem:[%s1376_s10] sm:$0xff]  ;;  %v412_v9 = vunpack.c.h.bf16 %v407_v4  ;;  %v414_v10 = vunpack.c.h.bf16 %v408_v5  ;;  %v420_v11 = vld [vmem:[%s1376_s10 + $0x8] sm:$0xff]  ;;  %v411_v13 = vunpack.c.l.bf16 %v407_v4  ;;  %v413_v17 = vunpack.c.l.bf16 %v408_v5  ;;  %v409_v20 = vld [vmem:[%s338_s25 + $0x10] sm:$0xff]  ;;  %s790_s13 = sshll.u32 %s1074_s24, 10  ;;  %p1511_p4 = scmp.ne.s32.totalorder %s1498_s14, 0 }
  0x94   : > { %v424_v12 = vunpack.c.h.bf16 %v419_v6  ;;  %v426_v16 = vunpack.c.h.bf16 %v420_v11  ;;  %v423_v18 = vunpack.c.l.bf16 %v419_v6  ;;  %v425_v19 = vunpack.c.l.bf16 %v420_v11  ;;  %v410_v21 = vld [vmem:[%s338_s25 + $0x18] sm:$0xff]  ;;  %v421_v22 = vld [vmem:[%s1376_s10 + $0x10] sm:$0xff]  ;;  %s386_s25 = scalar_lea.vmem [#allocation10], %s775_s17  ;;  %s1091_s11 = smov [#allocation10]  }
  0x95   : > { %v404_v23 = vunpack.c.h.bf16 %v397_v14  ;;  %v406_v24 = vunpack.c.h.bf16 %v398_v15  ;;  %v416_v25 = vunpack.c.h.bf16 %v409_v20  ;;  %v418_v26 = vunpack.c.h.bf16 %v410_v21  ;;  %v422_v27 = vld [vmem:[%s1376_s10 + $0x18] sm:$0xff]  ;;  %s608_s10 = sshll.u32 %s386_s25, 4  ;;  %s996_s15 = sshll.u32 %s1091_s11, 4  ;;  %s1416_s10 = int_to_ptr.vmem [resolvable:$true] %s608_s10  ;;  %s997_s15 = int_to_ptr.vmem [resolvable:$false] %s996_s15 }
  0x96   : > { %v428_v28 = vunpack.c.h.bf16 %v421_v22  ;;  %v430_v29 = vunpack.c.h.bf16 %v422_v27  ;;  %v403_v30 = vunpack.c.l.bf16 %v397_v14  ;;  %v405_v31 = vunpack.c.l.bf16 %v398_v15  ;;  %s992_s12 = scalar_lea.vmem %s1416_s10, 1024  ;;  %s998_s2 = scalar_lea.vmem %s997_s15, 2048 }
  0x97   : > { %v431_v32 = vstv %s1378_s20  ;;  %v440_v33 = vstv %s1380_s29  ;;  %v415_v34 = vunpack.c.l.bf16 %v409_v20  ;;  %v417_v35 = vunpack.c.l.bf16 %v410_v21  ;;  %v492_v20 = vld [vmem:[%s1470_s5 + $0x10] sm:$0xff]  ;;  %v490_v21 = vld [vmem:[%s1470_s5] sm:$0xff]  ;;  %s1414_s29 = scalar_lea.hbm %s1471_s6, %s790_s13  ;;  %p993_p7 = scmp.ne.s32.totalorder %s1416_s10, %s992_s12 }
  0x98   : > { %v433_v36 = vmul.f32 %v431_v32, %v400_v2  ;;  %v435_v37 = vmul.f32 %v431_v32, %v402_v3  ;;  %v442_v38 = vmul.f32 %v440_v33, %v412_v9  ;;  %v444_v39 = vmul.f32 %v440_v33, %v414_v10  ;;  %p999_p13 = scmp.lt.s32.totalorder %s1416_s10, %s997_s15  ;;  %p1000_p11 = scmp.lt.s32.totalorder %s998_s2, %s992_s12 }
  0x99   : > { %v457_v40 = vstv %s1382_s28  ;;  %v432_v41 = vmul.f32 %v431_v32, %v399_v7  ;;  %v434_v42 = vmul.f32 %v431_v32, %v401_v8  ;;  %v441_v43 = vmul.f32 %v440_v33, %v411_v13  ;;  %s593_s28 = scalar_lea.sflag [#allocation4], %s1363_s19  ;;  %p994_p1 = pnand %p993_p7, %p1511_p4 }
  0x9a   : > { %v450_v44 = vadd.f32 %v442_v38, %v433_v36  ;;  %v452_v45 = vadd.f32 %v444_v39, %v435_v37  ;;  %v459_v46 = vmul.f32 %v457_v40, %v424_v12  ;;  %v461_v47 = vmul.f32 %v457_v40, %v426_v16  ;;  %p1001_p0 = por %p1000_p11, %p999_p13 }
  0x9b   : > { %v443_v48 = vmul.f32 %v440_v33, %v413_v17  ;;  %v449_v49 = vadd.f32 %v441_v43, %v432_v41  ;;  %v458_v50 = vmul.f32 %v457_v40, %v423_v18  ;;  %v460_v51 = vmul.f32 %v457_v40, %v425_v19  ;;  %p995_p2 = pneg %p994_p1 }
  0x9c   : > { %v467_v52 = vadd.f32 %v459_v46, %v450_v44  ;;  %v469_v53 = vadd.f32 %v461_v47, %v452_v45  ;;  %v437_v54 = vmul.f32 %v431_v32, %v404_v23  ;;  %v439_v55 = vmul.f32 %v431_v32, %v406_v24 }
  0x9d   : > { %v451_v56 = vadd.f32 %v443_v48, %v434_v42  ;;  %v466_v57 = vadd.f32 %v458_v50, %v449_v49  ;;  %v446_v58 = vmul.f32 %v440_v33, %v416_v25  ;;  %v448_v59 = vmul.f32 %v440_v33, %v418_v26  ;;  %p1002_p5 = pnand %p1001_p0, %p995_p2 }
  0x9e   : > { %v475_v60 = vmax.f32 %v467_v52, 0.0  ;;  %v477_v61 = vmax.f32 %v469_v53, 0.0  ;;  %v463_v62 = vmul.f32 %v457_v40, %v428_v28  ;;  %v465_v63 = vmul.f32 %v457_v40, %v430_v29  ;;  %v491_v28 = vld [vmem:[%s1470_s5 + $0x8] sm:$0xff] }
  0x9f   : > { %v468_v0 = vadd.f32 %v460_v51, %v451_v56  ;;  %v474_v1 = vmax.f32 %v466_v57, 0.0  ;;  %v454_v2 = vadd.f32 %v446_v58, %v437_v54  ;;  %v456_v3 = vadd.f32 %v448_v59, %v439_v55 }
  0xa0   : > { %v487_v4 = vpack.c.bf16 %v477_v61, %v475_v60  ;;  %v427_v5 = vunpack.c.l.bf16 %v421_v22  ;;  %v429_v6 = vunpack.c.l.bf16 %v422_v27  ;;  %v436_v7 = vmul.f32 %v431_v32, %v403_v30  ;;  %v493_v27 = vld [vmem:[%s1470_s5 + $0x18] sm:$0xff] }
  0xa1   : > { %v476_v8 = vmax.f32 %v468_v0, 0.0  ;;  %v471_v9 = vadd.f32 %v463_v62, %v454_v2  ;;  %v473_v10 = vadd.f32 %v465_v63, %v456_v3  ;;  %v438_v11 = vmul.f32 %v431_v32, %v405_v31  ;;  %v885_v32 = vld [vmem:[%s1469_s4] sm:$0xff]  }
  0xa2   : > { %531 = vmatprep.subr.bf16.mxu0 %v487_v4  ;;  %791 = vmatprep.subr.bf16.mxu1 %v487_v4  ;;  %v445_v12 = vmul.f32 %v440_v33, %v415_v34  ;;  %v447_v13 = vmul.f32 %v440_v33, %v417_v35  ;;  %v462_v14 = vmul.f32 %v457_v40, %v427_v5  ;;  %v1090_v19 = vmov 0   ;;  %v886_v33 = vld [vmem:[%s1469_s4 + $0x8] sm:$0xff]  }
  0xa3   : > { %v486_v15 = vpack.c.bf16 %v476_v8, %v474_v1  ;;  %v479_v16 = vmax.f32 %v471_v9, 0.0  ;;  %v481_v17 = vmax.f32 %v473_v10, 0.0  ;;  %v464_v18 = vmul.f32 %v457_v40, %v429_v6  ;;  %563 = vmatprep.mubr.bf16.mxu0 %v1090_v19  ;;  %573 = vmatprep.mubr.bf16.mxu1 %v1090_v19 }
  0xa4   : > { %v453_v22 = vadd.f32 %v445_v12, %v436_v7  ;;  %v455_v23 = vadd.f32 %v447_v13, %v438_v11  ;;  %884 = vset.pattern.permute.xlu1 %v1090_v19  ;;  %883 = vset.pattern.permute.xlu0 %v1090_v19 }
  0xa5   : > { %532 = vmatpush1.bf16.msra.mxu0 %v486_v15  ;;  %793 = vmatpush1.bf16.msra.mxu1 %v486_v15  ;;  %v489_v24 = vpack.c.bf16 %v481_v17, %v479_v16 }
  0xa6   : > { %v470_v25 = vadd.f32 %v462_v14, %v453_v22  ;;  %v472_v26 = vadd.f32 %v464_v18, %v455_v23  ;;  %506 = vperm.xlu1 %884, %v492_v20   ;;  %496 = vperm.xlu0 %883, %v490_v21  }
  0xa7   : > { %533 = vmatprep.subr.bf16.mxu0 %v489_v24  ;;  %792 = vmatprep.subr.bf16.mxu1 %v489_v24 }
  0xa8   : > { %v478_v29 = vmax.f32 %v470_v25, 0.0  ;;  %v480_v30 = vmax.f32 %v472_v26, 0.0 }
  0xaa   : > { %v488_v31 = vpack.c.bf16 %v480_v30, %v478_v29  ;;  %511 = vperm.xlu1 %884, %v493_v27   ;;  %501 = vperm.xlu0 %883, %v491_v28  }
  0xac   : > { %534 = vmatpush1.bf16.msra.mxu0 %v488_v31  ;;  %794 = vmatpush1.bf16.msra.mxu1 %v488_v31 }
  0xaf   : > { %780 = vmatmul.mubr.msk.bf16.vlgmr.msra.gmra.mrb[0].mxu0 %vm524_vm0, %v885_v32  ;;  %781 = vmatmul.mubr.msk.bf16.vlgmr.msra.gmra.mrb[0].mxu1 %vm524_vm0, %v886_v33 }
 0x125   : > { %v507_v34 = vpop.permute.xlu1 %506  ;;  %v497_v35 = vpop.permute.xlu0 %496 }
 0x129   : > { %v512_v36 = vpop.permute.xlu1 %511  ;;  %v502_v37 = vpop.permute.xlu0 %501 }
 0x182   : > { %v565_v38 = vpop.f32.mrb[0].mxu0  ;;  %v575_v39 = vpop.f32.mrb[0].mxu1 }
 0x183   : > { %v566_v40 = vadd.f32 %v565_v38, %v497_v35  ;;  %v576_v41 = vadd.f32 %v575_v39, %v507_v34  ;;  %v567_v42 = vpop.f32.mrb[1].mxu0  ;;  %v577_v43 = vpop.f32.mrb[1].mxu1 }
 0x184   : > { %v568_v44 = vadd.f32 %v567_v42, %v497_v35  ;;  %v578_v45 = vadd.f32 %v577_v43, %v507_v34  ;;  %v569_v46 = vpop.f32.mrb[2].mxu0  ;;  %v579_v47 = vpop.f32.mrb[2].mxu1 }
 0x185   : > { %584 = vst [vmem:[%s386_s25] sm:$0xff] %v566_v40  ;;  %588 = vst [vmem:[%s386_s25 + $0x20] sm:$0xff] %v576_v41  ;;  %v570_v48 = vadd.f32 %v569_v46, %v502_v37  ;;  %v580_v49 = vadd.f32 %v579_v47, %v512_v36  ;;  %v571_v50 = vpop.f32.mrb[3].mxu0  ;;  %v581_v51 = vpop.f32.mrb[3].mxu1 }
 0x186   : > { %585 = vst [vmem:[%s386_s25 + $0x8] sm:$0xff] %v568_v44  ;;  %589 = vst [vmem:[%s386_s25 + $0x28] sm:$0xff] %v578_v45  ;;  %v572_v52 = vadd.f32 %v571_v50, %v502_v37  ;;  %v582_v53 = vadd.f32 %v581_v51, %v512_v36 }
 0x187   : > { %586 = vst [vmem:[%s386_s25 + $0x10] sm:$0xff] %v570_v48  ;;  %590 = vst [vmem:[%s386_s25 + $0x30] sm:$0xff] %v580_v49 }
 0x188   : > { %587 = vst [vmem:[%s386_s25 + $0x18] sm:$0xff] %v572_v52  ;;  %591 = vst [vmem:[%s386_s25 + $0x38] sm:$0xff] %v582_v53 }
 0x189   : > { %1005 = shalt.err (!%p1002_p5)
}
 0x18a   : > { %s1006_s8 = scalar_lea.hbm %s1414_s29, 1024  ;;  %s1010_s30 = scalar_lea.hbm %s1471_s6, 2048 }
 0x18b   : > { %p1007_p3 = scmp.ne.s32.totalorder %s1414_s29, %s1006_s8  ;;  %p1011_p10 = scmp.lt.u32.totalorder %s1414_s29, %s1471_s6 }
 0x18c   : > { %p1012_p8 = scmp.lt.u32.totalorder %s1010_s30, %s1006_s8  ;;  %p1014_p7 = scmp.lt.u32.totalorder %s1006_s8, %s1414_s29 }
 0x18d   : > { %p1008_p6 = pnand %p1007_p3, %p1511_p4 }
 0x18e   : > { %p1013_p12 = por %p1012_p8, %p1011_p10 }
 0x18f   : > { %p1009_p9 = pneg %p1008_p6 }
 0x190   : > { %p1015_p1 = por %p1014_p7, %p1013_p12 }
 0x192   : > { %p1016_p2 = pnand %p1015_p1, %p1009_p9 }
 0x194   : > { %1019 = shalt.err (!%p1016_p2)
}
 0x195   : > { %s1092_s26 = smov 256   ;;  %s1093_s0 = smov 16  }
 0x196   : > { %805 = dma.vmem_to_hbm [thread:$0]  (%p1511_p4), %s1416_s10, 1024, %s1414_s29, %s593_s28, %s1092_s26, %s1092_s26, %s1093_s0  }
 0x197 PF: > { %s1512_s17 = sld [smem:[#allocation16_spill]]  ;;  %s623_s13 = sand.u32 1, %s1062_s21  }
 0x198   : > { %p1513_p13 = scmp.ne.s32.totalorder %s1499_s16, 0  ;;  %s624_s25 = scalar_lea.sflag [#allocation4], %s623_s13 }
 0x19d   : > { %p1514_p11 = scmp.ge.s32.totalorder %s1512_s17, 2 }
 0x19f   : > { %p822_p0 = pnand %p1514_p11, %p1513_p13 }
 0x1a1   : > { %1057 = dma.done.wait (!%p822_p0), %s624_s25, 1024  }
 0x1a2   : > { %1059 = vsyncadd (!%p822_p0), %s624_s25, 4294966272  ;;  %s26_s26 = sadd.s32 1, %s1512_s17   ;;  %s1515_s20 = sld [smem:[#allocation18_spill]] }
 0x1a3   : > { %p23_p5 = scmp.ge.s32.totalorder %s26_s26, 4   ;;  %s1516_s24 = sld [smem:[#allocation15_spill]] }
 0x1a4   : > { %s1517_s25 = sld [smem:[#allocation17_spill]]  ;;  %s1518_s21 = smov %s1066_s22 }
 0x1a5   : > { %s1519_s22 = smov %s1070_s23  ;;  %25 = sbr.rel (!%p23_p5) target bundleno = 12 (0xc), region = 118 }
 0x1a8   : > { %s1520_s23 = smov %s1515_s20 }
 0x1ac   :  { %629 = vsyncpa [#allocation3], 1 }
 0x1ad   :  { %631 = vsyncpa [#allocation3 + $0x1], 1 }
 0x1ae   :  { %632 = vsyncpa [#allocation8], 1 }
 0x1af   :  { %634 = vsyncpa [#allocation8 + $0x1], 1 }
 0x1b0   :  { %635 = vsyncpa [#allocation4], 1 }
 0x1b1   :  { %637 = vsyncpa [#allocation4 + $0x1], 1 }
 0x1b2   :  { %638 = vsyncpa [#allocation5], 1 }
 0x1b3   :  { %640 = vsyncpa [#allocation5 + $0x1], 1 }

</bundles_post_ra>
